<compile_context>
chip_gen: v5e
topology: v5e:2x2
jax: 0.10.0
libtpu: 0.0.40
codegen_flags: <defaults>
</compile_context>

<pallas_src>
import functools

import jax
import jax.numpy as jnp
from jax.experimental import pallas as pl
from jax.experimental.pallas import tpu as pltpu


def _round_up(x, m):
    return ((x + m - 1) // m) * m


# ---------------------------------------------------------------------------
# Kernel A: fused conv1 (9x9 as one K=81 matmul) + ReLU + conv2 (1x1) + ReLU.
# Channel-major layout: output pixels on the lane axis (lane-dense).
# ---------------------------------------------------------------------------
def _fused_conv12_kernel(pt_ref, w1_ref, b1_ref, w2_ref, b2_ref, o_ref):
    # pt_ref: (1, 81, BM)  tap-major im2col columns for this image band
    # w1_ref: (64, 81), b1_ref: (64, 1)
    # w2_ref: (32, 64), b2_ref: (32, 1)
    # o_ref : (1, 32, BM)  channel-major activations, BM is a multiple of 128
    p = pt_ref[0]                                              # (81, BM)
    x1 = jnp.dot(w1_ref[...], p, preferred_element_type=jnp.float32)
    x1 = jnp.maximum(x1 + b1_ref[...], 0.0)                    # (64, BM)
    x2 = jnp.dot(w2_ref[...], x1, preferred_element_type=jnp.float32)
    x2 = jnp.maximum(x2 + b2_ref[...], 0.0)                    # (32, BM)
    o_ref[0] = x2.astype(o_ref.dtype)


# ---------------------------------------------------------------------------
# Kernel B: conv3 (5x5, 32 -> 1).  Channel-major input with W on lanes; the
# output is the (H, W) image directly (NCHW, Cout=1 -> no final transpose).
# Per-channel scalar weights are read from SMEM; accumulation on the VPU.
# ---------------------------------------------------------------------------
def _conv3_kernel(x2p_ref, w3_ref, b3_ref, o_ref, *, KH, KW, C):
    # x2p_ref: (1, C, Hp, Wp) replicate-padded, channel-major activations
    # w3_ref : (C*KH*KW,) f32 in SMEM, index = c*KH*KW + kh*KW + kw
    # b3_ref : (1,) f32 in SMEM
    # o_ref  : (1, H, W)
    H = o_ref.shape[1]
    W = o_ref.shape[2]

    def body(c, acc):
        img = x2p_ref[0, c]                                    # (Hp, Wp)
        for kh in range(KH):
            for kw in range(KW):
                wscal = w3_ref[c * (KH * KW) + kh * KW + kw]
                acc = acc + img[kh:kh + H, kw:kw + W] * wscal
        return acc

    acc0 = jnp.full((H, W), b3_ref[0], jnp.float32)
    acc = jax.lax.fori_loop(0, C, body, acc0)
    o_ref[0] = acc.astype(o_ref.dtype)


# ---------------------------------------------------------------------------
# Wrapper
# ---------------------------------------------------------------------------
def _im2col_tap_major(xp, KH, KW, Ho, Wo):
    """xp: (N, Hp, Wp) -> (N, KH*KW, Ho*Wo); tap rows ordered kh-major."""
    N = xp.shape[0]
    cols = []
    for kh in range(KH):
        for kw in range(KW):
            cols.append(xp[:, kh:kh + Ho, kw:kw + Wo].reshape(N, Ho * Wo))
    return jnp.stack(cols, axis=1)


def srcnn_forward(x_nchw, p):
    """SRCNN forward pass. Input/output NCHW (C=1), like the PyTorch module."""
    N, Cin, H, W = x_nchw.shape
    assert Cin == 1
    x = x_nchw[:, 0].astype(jnp.float32)                       # (N, H, W)

    # conv1 geometry: replicate pad 2, 9x9 valid conv (as in the module).
    K1 = 9
    KK = K1 * K1
    xp1 = jnp.pad(x, ((0, 0), (2, 2), (2, 2)), mode="edge")    # (N, H+4, W+4)
    Ho1, Wo1 = H - 4, W - 4
    M1 = Ho1 * Wo1

    # Tap-major im2col (layout glue; all conv FLOPs stay in the kernel).
    pt = _im2col_tap_major(xp1, K1, K1, Ho1, Wo1)              # (N, 81, M1)
    BM = min(1024, _round_up(M1, 128))        # lane-aligned pixel band size
    M1p = _round_up(M1, BM)
    pt = jnp.pad(pt, ((0, 0), (0, 0), (0, M1p - M1)))          # zero pad cols

    # Dense 2D, channel-major weights.
    w1t = p["w1"].reshape(64, KK).astype(jnp.float32)          # (64, 81)
    b1 = p["b1"].reshape(64, 1).astype(jnp.float32)
    w2t = p["w2"].reshape(32, 64).astype(jnp.float32)          # (32, 64)
    b2 = p["b2"].reshape(32, 1).astype(jnp.float32)

    x2t = pl.pallas_call(
        _fused_conv12_kernel,
        out_shape=jax.ShapeDtypeStruct((N, 32, M1p), jnp.float32),
        grid=(N, M1p // BM),
        in_specs=[
            pl.BlockSpec((1, KK, BM), lambda n, t: (n, 0, t)),
            pl.BlockSpec((64, KK), lambda n, t: (0, 0)),
            pl.BlockSpec((64, 1), lambda n, t: (0, 0)),
            pl.BlockSpec((32, 64), lambda n, t: (0, 0)),
            pl.BlockSpec((32, 1), lambda n, t: (0, 0)),
        ],
        out_specs=pl.BlockSpec((1, 32, BM), lambda n, t: (n, 0, t)),
        compiler_params=pltpu.CompilerParams(
            dimension_semantics=("parallel", "parallel")),
    )(pt, w1t, b1, w2t, b2)

    # conv2's replicate pad (2) commutes with the pointwise 1x1 conv, so it is
    # merged with conv3's replicate pad (2) into a single edge pad of 4.
    x2 = x2t[:, :, :M1].reshape(N, 32, Ho1, Wo1)               # channel-major
    x2p = jnp.pad(x2, ((0, 0), (0, 0), (4, 4), (4, 4)), mode="edge")
    Hp2, Wp2 = Ho1 + 8, Wo1 + 8                                # = H+4, W+4

    K3 = 5
    w3_flat = p["w3"].reshape(-1).astype(jnp.float32)          # (32*25,)
    b3 = p["b3"].reshape(1).astype(jnp.float32)

    kernel_b = functools.partial(_conv3_kernel, KH=K3, KW=K3, C=32)
    out = pl.pallas_call(
        kernel_b,
        out_shape=jax.ShapeDtypeStruct((N, H, W), jnp.float32),
        grid=(N,),
        in_specs=[
            pl.BlockSpec((1, 32, Hp2, Wp2), lambda n: (n, 0, 0, 0)),
            pl.BlockSpec(memory_space=pltpu.MemorySpace.SMEM),
            pl.BlockSpec(memory_space=pltpu.MemorySpace.SMEM),
        ],
        out_specs=pl.BlockSpec((1, H, W), lambda n: (n, 0, 0)),
        compiler_params=pltpu.CompilerParams(
            dimension_semantics=("parallel",)),
    )(x2p, w3_flat, b3)

    return out[:, None, :, :]                                  # (N, 1, H, W)


def init_params(key):
    """Deterministic PyTorch-Conv2d-style init (uniform +/- 1/sqrt(fan_in))."""
    def conv_init(k, cout, cin, ksz):
        fan_in = cin * ksz * ksz
        bound = 1.0 / (fan_in ** 0.5)
        kw_, kb_ = jax.random.split(k)
        w = jax.random.uniform(kw_, (cout, cin, ksz, ksz), jnp.float32,
                               -bound, bound)
        b = jax.random.uniform(kb_, (cout,), jnp.float32, -bound, bound)
        return w, b

    k1, k2, k3 = jax.random.split(key, 3)
    w1, b1 = conv_init(k1, 64, 1, 9)
    w2, b2 = conv_init(k2, 32, 64, 1)
    w3, b3 = conv_init(k3, 1, 32, 5)
    return dict(w1=w1, b1=b1, w2=w2, b2=b2, w3=w3, b3=b3)


def _reference_forward(x_nchw, p):
    """Pure-JAX reference (lax.conv) for correctness checking."""
    def conv(x_nhwc, w_oihw, b, pad):
        xp = jnp.pad(x_nhwc, ((0, 0), (pad, pad), (pad, pad), (0, 0)),
                     mode="edge")
        w = jnp.transpose(w_oihw, (2, 3, 1, 0))  # HWIO
        y = jax.lax.conv_general_dilated(
            xp, w, window_strides=(1, 1), padding="VALID",
            dimension_numbers=("NHWC", "HWIO", "NHWC"))
        return y + b[None, None, None, :]

    x = jnp.transpose(x_nchw, (0, 2, 3, 1)).astype(jnp.float32)
    x = jax.nn.relu(conv(x, p["w1"], p["b1"], 2))
    x = jax.nn.relu(conv(x, p["w2"], p["b2"], 2))
    x = conv(x, p["w3"], p["b3"], 2)
    return jnp.transpose(x, (0, 3, 1, 2))


if __name__ == "__main__":
    key = jax.random.PRNGKey(0)
    kx, kp = jax.random.split(key)

    N, C, H, W = 2, 1, 16, 16
    x = jax.random.normal(kx, (N, C, H, W), jnp.float32)
    params = init_params(kp)

    out = srcnn_forward(x, params)
    out = jax.block_until_ready(out)
    assert out.shape == (N, 1, H, W), out.shape

    ref = _reference_forward(x, params)
    max_err = float(jnp.max(jnp.abs(out - ref)))
    assert jnp.allclose(out, ref, rtol=2e-3, atol=2e-3), max_err

    print("KERNEL_OK")
</pallas_src>

<mosaic_0001>
module attributes {stable_mosaic.version = 11 : i64} {
  func.func @_fused_conv12_kernel(%arg0: i32, %arg1: i32, %arg2: memref<1x81x256xf32, #tpu.memory_space<vmem>>, %arg3: memref<64x81xf32, #tpu.memory_space<vmem>>, %arg4: memref<64x1xf32, #tpu.memory_space<vmem>>, %arg5: memref<32x64xf32, #tpu.memory_space<vmem>>, %arg6: memref<32x1xf32, #tpu.memory_space<vmem>>, %arg7: memref<1x32x256xf32, #tpu.memory_space<vmem>>) attributes {dimension_semantics = [#tpu.dimension_semantics<parallel>, #tpu.dimension_semantics<parallel>], iteration_bounds = array<i64: 2, 1>, scalar_prefetch = 0 : i64, scratch_operands = 0 : i64, tpu.core_type = #tpu.core_type<tc>, window_params = [{transform_indices = @transform_0, window_bounds = array<i64: 1, 81, 256>}, {pipeline_mode = #tpu.pipeline_mode<synchronous>, transform_indices = @transform_1, window_bounds = array<i64: 64, 81>}, {pipeline_mode = #tpu.pipeline_mode<synchronous>, transform_indices = @transform_2, window_bounds = array<i64: 64, 1>}, {pipeline_mode = #tpu.pipeline_mode<synchronous>, transform_indices = @transform_3, window_bounds = array<i64: 32, 64>}, {pipeline_mode = #tpu.pipeline_mode<synchronous>, transform_indices = @transform_4, window_bounds = array<i64: 32, 1>}, {transform_indices = @transform_5, window_bounds = array<i64: 1, 32, 256>}]} {
    %c0 = arith.constant 0 : index
    %c0_0 = arith.constant 0 : index
    %c0_1 = arith.constant 0 : index
    %0 = vector.load %arg2[%c0, %c0_0, %c0_1] : memref<1x81x256xf32, #tpu.memory_space<vmem>>, vector<1x81x256xf32>
    %1 = vector.shape_cast %0 : vector<1x81x256xf32> to vector<81x256xf32>
    %c0_2 = arith.constant 0 : index
    %c0_3 = arith.constant 0 : index
    %2 = vector.load %arg3[%c0_2, %c0_3] : memref<64x81xf32, #tpu.memory_space<vmem>>, vector<64x81xf32>
    %cst = arith.constant dense<0.000000e+00> : vector<64x256xf32>
    %3 = tpu.matmul %2, %1, %cst {dimension_numbers = #tpu.dot_dimension_numbers<[1], [0], [0], [1], [0, 0, 1, 1], [], []>} : vector<64x81xf32>, vector<81x256xf32>, vector<64x256xf32> -> vector<64x256xf32>
    %c0_4 = arith.constant 0 : index
    %c0_5 = arith.constant 0 : index
    %4 = vector.load %arg4[%c0_4, %c0_5] : memref<64x1xf32, #tpu.memory_space<vmem>>, vector<64x1xf32>
    %5 = vector.broadcast %4 : vector<64x1xf32> to vector<64x256xf32>
    %6 = arith.addf %3, %5 : vector<64x256xf32>
    %cst_6 = arith.constant 0.000000e+00 : f32
    %7 = vector.broadcast %cst_6 : f32 to vector<64x256xf32>
    %8 = arith.maximumf %6, %7 : vector<64x256xf32>
    %c0_7 = arith.constant 0 : index
    %c0_8 = arith.constant 0 : index
    %9 = vector.load %arg5[%c0_7, %c0_8] : memref<32x64xf32, #tpu.memory_space<vmem>>, vector<32x64xf32>
    %cst_9 = arith.constant dense<0.000000e+00> : vector<32x256xf32>
    %10 = tpu.matmul %9, %8, %cst_9 {dimension_numbers = #tpu.dot_dimension_numbers<[1], [0], [0], [1], [0, 0, 1, 1], [], []>} : vector<32x64xf32>, vector<64x256xf32>, vector<32x256xf32> -> vector<32x256xf32>
    %c0_10 = arith.constant 0 : index
    %c0_11 = arith.constant 0 : index
    %11 = vector.load %arg6[%c0_10, %c0_11] : memref<32x1xf32, #tpu.memory_space<vmem>>, vector<32x1xf32>
    %12 = vector.broadcast %11 : vector<32x1xf32> to vector<32x256xf32>
    %13 = arith.addf %10, %12 : vector<32x256xf32>
    %cst_12 = arith.constant 0.000000e+00 : f32
    %14 = vector.broadcast %cst_12 : f32 to vector<32x256xf32>
    %15 = arith.maximumf %13, %14 : vector<32x256xf32>
    %c0_13 = arith.constant 0 : index
    %c0_14 = arith.constant 0 : index
    %c0_15 = arith.constant 0 : index
    %16 = vector.load %arg7[%c0_13, %c0_14, %c0_15] : memref<1x32x256xf32, #tpu.memory_space<vmem>>, vector<1x32x256xf32>
    %17 = vector.shape_cast %16 : vector<1x32x256xf32> to vector<32x256xf32>
    %18 = vector.shape_cast %15 : vector<32x256xf32> to vector<1x32x256xf32>
    tpu.vector_store %arg7[%c0_13, %c0_14, %c0_15], %18 {strides = array<i32>} : memref<1x32x256xf32, #tpu.memory_space<vmem>>, vector<1x32x256xf32>,
    return
  }
  func.func @transform_0(%arg0: i32, %arg1: i32) -> (i32, i32, i32) {
    %c0_i32 = arith.constant 0 : i32
    %c0_i32_0 = arith.constant 0 : i32
    return %arg0, %c0_i32, %arg1 : i32, i32, i32
  }
  func.func @transform_1(%arg0: i32, %arg1: i32) -> (i32, i32) {
    %c0_i32 = arith.constant 0 : i32
    %c0_i32_0 = arith.constant 0 : i32
    %c0_i32_1 = arith.constant 0 : i32
    return %c0_i32, %c0_i32_0 : i32, i32
  }
  func.func @transform_2(%arg0: i32, %arg1: i32) -> (i32, i32) {
    %c0_i32 = arith.constant 0 : i32
    %c0_i32_0 = arith.constant 0 : i32
    %c0_i32_1 = arith.constant 0 : i32
    return %c0_i32, %c0_i32_0 : i32, i32
  }
  func.func @transform_3(%arg0: i32, %arg1: i32) -> (i32, i32) {
    %c0_i32 = arith.constant 0 : i32
    %c0_i32_0 = arith.constant 0 : i32
    %c0_i32_1 = arith.constant 0 : i32
    return %c0_i32, %c0_i32_0 : i32, i32
  }
  func.func @transform_4(%arg0: i32, %arg1: i32) -> (i32, i32) {
    %c0_i32 = arith.constant 0 : i32
    %c0_i32_0 = arith.constant 0 : i32
    %c0_i32_1 = arith.constant 0 : i32
    return %c0_i32, %c0_i32_0 : i32, i32
  }
  func.func @transform_5(%arg0: i32, %arg1: i32) -> (i32, i32, i32) {
    %c0_i32 = arith.constant 0 : i32
    %c0_i32_0 = arith.constant 0 : i32
    return %arg0, %c0_i32, %arg1 : i32, i32, i32
  }
}

</mosaic_0001>

<bundles_post_ra>
// kernel: tpu_custom_call.1
= control target key start
LH: loop header
LB: loop body
LE: loop exit
PB: predicated region body
PF: predicated region fallthrough
CT: control target
= control target key end

     0   :  { %10 = vsyncpa [#allocation3], 0  ;;  %s1134_s0 = inlined_call_operand.vmem [shape: f32[2,81,256], index: 0, kind: input, shape index: {}]   ;;  %s1135_s1 = inlined_call_operand.vmem [shape: f32[64,81], index: 1, kind: input, shape index: {}]   ;;  %s1136_s2 = inlined_call_operand.vmem [shape: f32[64,1], index: 2, kind: input, shape index: {}]   ;;  %s1137_s3 = inlined_call_operand.vmem [shape: f32[32,64], index: 3, kind: input, shape index: {}]   ;;  %s1138_s4 = inlined_call_operand.vmem [shape: f32[32,1], index: 4, kind: input, shape index: {}]   ;;  %s1139_s5 = inlined_call_operand.hbm [shape: f32[2,32,256], index: 5, kind: output, shape index: {}]  }
   0x1   :  { %12 = vsyncpa [#allocation3 + $0x1], 0  ;;  %s910_s18 = smov 0   ;;  %s912_s19 = smov 0  }
   0x2   :  { %s914_s20 = smov 0   ;;  %s916_s21 = smov 0  }
   0x3   :  { %s918_s22 = smov 0   ;;  %s920_s23 = smov 0  }
   0x4 LB: > { %s674_s24 = sadd.s32 4294967295, %s875_s23   ;;  %s675_s25 = sadd.s32 4294967294, %s875_s23   ;;  %s875_s23 = sphi %s920_s23, %s18_s23   ;;  %s871_s22 = sphi %s918_s22, %s1146_s22   ;;  %s867_s21 = sphi %s916_s21, %s1145_s21   ;;  %s863_s20 = sphi %s914_s20, %s1144_s20   ;;  %s859_s19 = sphi %s912_s19, %s1143_s19   ;;  %s855_s18 = sphi %s910_s18, %s1142_s18  }
   0x5   : > { %s30_s26 = sadd.s32 1, %s871_s22  ;;  %s151_s27 = sadd.s32 1, %s863_s20 }
   0x6   : > { %p32_p0 = scmp.ge.s32.totalorder %s30_s26, 2  ;;  %p161_p1 = scmp.ne.s32.totalorder %s863_s20, %s859_s19 }
   0x7   : > { %p162_p2 = scmp.eq.s32.totalorder %s674_s24, 1  ;;  %p167_p3 = scmp.ne.s32.totalorder %s859_s19, %s855_s18 }
   0x8   : > { %s1148_s26 = smov (%p32_p0, %s30_s26), 0  ;;  %p168_p5 = scmp.eq.s32.totalorder %s675_s25, 1 }
   0x9   : > { %p950_p4 = por %p162_p2, %p161_p1  ;;  %s146_s29 = ssub.s32 %s871_s22, %s1148_s26 }
   0xa   : > { %p678_p6 = scmp.ge.s32.totalorder %s875_s23, 1  ;;  %p149_p7 = scmp.eq.s32.totalorder %s146_s29, 0 }
   0xb   : > { %p957_p8 = por %p168_p5, %p167_p3  ;;  %p211_p9 = scmp.lt.s32.totalorder %s875_s23, 3 }
   0xc   : > { %s963_s6 = scalar_select %p149_p7, %s863_s20, %s151_s27  }
   0xd   : > { %p212_p10 = pnand %p678_p6, %p211_p9 }
   0xe   : > { %p244_p11 = scmp.lt.s32.totalorder (!%p212_p10), %s867_s21, 1  ;;  %s712_s24 = sshll.u32 (!%p212_p10), %s867_s21, 6 }
   0xf   : > { %215 = sbr.rel (%p212_p10) target bundleno = 393 (0x189), region = 40  ;;  %s591_s29 = scalar_lea.hbm (!%p212_p10), %s1139_s5, %s712_s24 }
  0x10   : > { %s594_s8 = sshll.u32 (!%p212_p10), %s591_s29, 4  ;;  %s817_s13 = scalar_lea.hbm (!%p212_p10), %s1139_s5, 128  ;;  %s595_s8 = int_to_ptr.hbm [resolvable:$true] %s594_s8 }
  0x11   : > { %s811_s9 = sshra.s32 (!%p212_p10), %s595_s8, 4  ;;  %s812_s9 = int_to_ptr.hbm [resolvable:$true] %s811_s9 }
  0x12   : > { %s813_s10 = scalar_lea.hbm (!%p212_p10), %s812_s9, 64  ;;  %p818_p1 = scmp.lt.s32.totalorder (!%p212_p10), %s812_s9, %s1139_s5 }
  0x13   : > { %p814_p12 = scmp.ne.s32.totalorder (!%p212_p10), %s812_s9, %s813_s10  ;;  %p819_p2 = scmp.lt.s32.totalorder (!%p212_p10), %s817_s13, %s813_s10 }
  0x14   : > { %v289_v0 = vld [vmem:[%s1136_s2 + $0x28] sm:$0xff]  ;;  %v877_v1 = vmov 0   ;;  %v291_v2 = vld [vmem:[%s1136_s2 + $0x38] sm:$0xff]  ;;  %s245_s11 = scalar_select %p244_p11, %s867_s21, 1  ;;  %vm357_vm0 = vcmask 1040384   ;;  %v288_v17 = vld [vmem:[%s1136_s2 + $0x20] sm:$0xff] }
  0x15   : > { %795 = vset.pattern.permute.xlu1 %v877_v1  ;;  %794 = vset.pattern.permute.xlu0 %v877_v1  ;;  %v276_v26 = vld [vmem:[%s1135_s1] sm:$0xff]  ;;  %vm332_vm1 = vcmask 662528   ;;  %v290_v27 = vld [vmem:[%s1136_s2 + $0x30] sm:$0xff]  ;;  %v277_v30 = vld [vmem:[%s1135_s1 + $0x8] sm:$0xff]  ;;  %vm490_vm2 = vcmask 523264   ;;  %p815_p13 = pnand %p814_p12, %p950_p4  ;;  %p820_p3 = por %p819_p2, %p818_p1 }
  0x16   : > { %319 = vperm.xlu1 %795, %v289_v0   ;;  %329 = vperm.xlu0 %794, %v291_v2   ;;  %s735_s12 = smul.u32 176, %s245_s11  ;;  %v284_v28 = vld [vmem:[%s1136_s2] sm:$0xff]  ;;  %v282_v29 = vld [vmem:[%s1135_s1 + $0x30] sm:$0xff]  ;;  %v285_v31 = vld [vmem:[%s1136_s2 + $0x8] sm:$0xff] }
  0x17   : > { %796 = vset.pattern.permute.xlu2 %v877_v1  ;;  %v283_v32 = vld [vmem:[%s1135_s1 + $0x38] sm:$0xff]  ;;  %v468_v34 = vld [vmem:[%s1138_s4 + $0x10] sm:$0xff]  ;;  %v467_v36 = vld [vmem:[%s1138_s4 + $0x8] sm:$0xff]  ;;  %p816_p0 = pneg %p815_p13 }
  0x18   : > { %s976_s15 = scalar_lea.vmem %s1134_s0, %s735_s12  ;;  %v287_v33 = vld [vmem:[%s1136_s2 + $0x18] sm:$0xff]  ;;  %v278_v35 = vld [vmem:[%s1135_s1 + $0x10] sm:$0xff]  ;;  %v466_v39 = vld [vmem:[%s1138_s4] sm:$0xff] }
  0x19   : > { %v274_v3 = vld [vmem:[%s976_s15 + $0xa0] sm:$0x1]  ;;  %v275_v4 = vld [vmem:[%s976_s15 + $0xa8] sm:$0x1]  ;;  %v272_v5 = vld [vmem:[%s976_s15 + $0x90] sm:$0xff]  ;;  %309 = vperm.xlu2 %796, %v287_v33   ;;  %p821_p5 = pnand %p820_p3, %p816_p0 }
  0x1a   : > { %681 = vmatpush.msk.msra.mxu0 %vm357_vm0, %v274_v3  ;;  %690 = vmatpush.msk.msra.mxu1 %vm357_vm0, %v275_v4  ;;  %v273_v6 = vld [vmem:[%s976_s15 + $0x98] sm:$0xff]  ;;  %v270_v7 = vld [vmem:[%s976_s15 + $0x80] sm:$0xff]  ;;  %v271_v8 = vld [vmem:[%s976_s15 + $0x88] sm:$0xff] }
  0x1b   : > { %713 = vmatpush.msk.msra.mxu2 %vm357_vm0, %v274_v3  ;;  %724 = vmatpush.msk.msra.mxu3 %vm357_vm0, %v275_v4  ;;  %v268_v9 = vld [vmem:[%s976_s15 + $0x70] sm:$0xff]  ;;  %v269_v10 = vld [vmem:[%s976_s15 + $0x78] sm:$0xff]  ;;  %v266_v11 = vld [vmem:[%s976_s15 + $0x60] sm:$0xff] }
  0x1c   : > { %370 = vmatpush.msra.mxu0 %v272_v5  ;;  %411 = vmatpush.msra.mxu1 %v273_v6  ;;  %v267_v12 = vld [vmem:[%s976_s15 + $0x68] sm:$0xff]  ;;  %v264_v13 = vld [vmem:[%s976_s15 + $0x50] sm:$0xff]  ;;  %v265_v14 = vld [vmem:[%s976_s15 + $0x58] sm:$0xff] }
  0x1d   : > { %714 = vmatpush.msra.mxu2 %v272_v5  ;;  %725 = vmatpush.msra.mxu3 %v273_v6  ;;  %v262_v15 = vld [vmem:[%s976_s15 + $0x40] sm:$0xff]  ;;  %v263_v16 = vld [vmem:[%s976_s15 + $0x48] sm:$0xff]  ;;  %v260_v18 = vld [vmem:[%s976_s15 + $0x30] sm:$0xff] }
  0x1e   : > { %371 = vmatpush.msra.mxu0 %v270_v7  ;;  %412 = vmatpush.msra.mxu1 %v271_v8  ;;  %v261_v19 = vld [vmem:[%s976_s15 + $0x38] sm:$0xff]  ;;  %v258_v20 = vld [vmem:[%s976_s15 + $0x20] sm:$0xff]  ;;  %v259_v21 = vld [vmem:[%s976_s15 + $0x28] sm:$0xff] }
  0x1f   : > { %715 = vmatpush.msra.mxu2 %v270_v7  ;;  %726 = vmatpush.msra.mxu3 %v271_v8  ;;  %v256_v22 = vld [vmem:[%s976_s15 + $0x10] sm:$0xff]  ;;  %v257_v23 = vld [vmem:[%s976_s15 + $0x18] sm:$0xff]  ;;  %v254_v24 = vld [vmem:[%s976_s15] sm:$0xff] }
  0x20   : > { %372 = vmatpush.msra.mxu0 %v268_v9  ;;  %413 = vmatpush.msra.mxu1 %v269_v10  ;;  %v255_v25 = vld [vmem:[%s976_s15 + $0x8] sm:$0xff]  ;;  %v286_v37 = vld [vmem:[%s1136_s2 + $0x10] sm:$0xff]  ;;  %v279_v38 = vld [vmem:[%s1135_s1 + $0x18] sm:$0xff]  ;;  %s240_s15 = sand.u32 1, %s859_s19  }
  0x21   : > { %716 = vmatpush.msra.mxu2 %v268_v9  ;;  %727 = vmatpush.msra.mxu3 %v269_v10  ;;  %v280_v40 = vld [vmem:[%s1135_s1 + $0x20] sm:$0xff]  ;;  %v469_v41 = vld [vmem:[%s1138_s4 + $0x18] sm:$0xff]  ;;  %v281_v42 = vld [vmem:[%s1135_s1 + $0x28] sm:$0xff]  ;;  %s679_s16 = sshll.u32 %s240_s15, 6  ;;  %s578_s21 = scalar_lea.sflag [#allocation3], %s240_s15 }
  0x22   : > { %373 = vmatpush.msra.mxu0 %v266_v11  ;;  %414 = vmatpush.msra.mxu1 %v267_v12  ;;  %s1085_s17 = scalar_lea.vmem [#allocation2], %s679_s16 }
  0x23   : > { %717 = vmatpush.msra.mxu2 %v266_v11  ;;  %728 = vmatpush.msra.mxu3 %v267_v12  ;;  %s592_s7 = sshll.u32 %s1085_s17, 4  ;;  %s593_s7 = int_to_ptr.vmem [resolvable:$true] %s592_s7 }
  0x24   : > { %374 = vmatpush.msra.mxu0 %v264_v13  ;;  %415 = vmatpush.msra.mxu1 %v265_v14 }
  0x25   : > { %718 = vmatpush.msra.mxu2 %v264_v13  ;;  %729 = vmatpush.msra.mxu3 %v265_v14 }
  0x26   : > { %375 = vmatpush.msra.mxu0 %v262_v15  ;;  %416 = vmatpush.msra.mxu1 %v263_v16 }
  0x27   : > { %314 = vperm.xlu1 %795, %v288_v17   ;;  %719 = vmatpush.msra.mxu2 %v262_v15 }
  0x28   : > { %376 = vmatpush.msra.mxu0 %v260_v18  ;;  %417 = vmatpush.msra.mxu1 %v261_v19 }
  0x29   : > { %730 = vmatpush.msra.mxu3 %v263_v16  ;;  %720 = vmatpush.msra.mxu2 %v260_v18 }
  0x2a   : > { %377 = vmatpush.msra.mxu0 %v258_v20  ;;  %418 = vmatpush.msra.mxu1 %v259_v21 }
  0x2b   : > { %731 = vmatpush.msra.mxu3 %v261_v19  ;;  %721 = vmatpush.msra.mxu2 %v258_v20 }
  0x2c   : > { %378 = vmatpush.msra.mxu0 %v256_v22  ;;  %419 = vmatpush.msra.mxu1 %v257_v23 }
  0x2d   : > { %732 = vmatpush.msra.mxu3 %v259_v21  ;;  %722 = vmatpush.msra.mxu2 %v256_v22 }
  0x2e   : > { %379 = vmatpush.msra.mxu0 %v254_v24  ;;  %420 = vmatpush.msra.mxu1 %v255_v25 }
  0x2f   : > { %682 = vmatmul.msk.f32.vlgmr.msra.gmra.mxu0 %vm332_vm1, %v276_v26  ;;  %691 = vmatmul.msk.f32.vlgmr.msra.gmra.mxu1 %vm332_vm1, %v276_v26 }
  0x30   : > { %733 = vmatpush.msra.mxu3 %v257_v23  ;;  %324 = vperm.xlu0 %794, %v290_v27  }
  0x31   : > { %294 = vperm.xlu1 %795, %v284_v28   ;;  %723 = vmatpush.msra.mxu2 %v254_v24 }
  0x32   : > { %734 = vmatpush.msra.mxu3 %v255_v25  ;;  %688 = vmatmul.msk.f32.vlgmr.msra.gmra.mxu2 %vm332_vm1, %v282_v29 }
  0x33   : > { %697 = vmatmul.msk.f32.vlgmr.msra.gmra.mxu3 %vm332_vm1, %v282_v29  ;;  %304 = vperm.xlu2 %796, %v286_v37   ;;  %v464_v37 = vld [vmem:[%s1137_s3 + $0x10] sm:$0xff] }
  0x37   : > { %683 = vmatmul.msk.f32.gmra.mxu0 %vm332_vm1, %v277_v30  ;;  %692 = vmatmul.msk.f32.gmra.mxu1 %vm332_vm1, %v277_v30 }
  0x38   : > { %299 = vperm.xlu0 %794, %v285_v31  }
  0x39   : > { %482 = vperm.xlu1 %795, %v468_v34  }
  0x3a   : > { %689 = vmatmul.msk.f32.gmra.mxu2 %vm332_vm1, %v283_v32 }
  0x3b   : > { %698 = vmatmul.msk.f32.gmra.mxu3 %vm332_vm1, %v283_v32  ;;  %472 = vperm.xlu2 %796, %v466_v39  }
  0x3f   : > { %684 = vmatmul.msk.f32.gmra.mxu0 %vm332_vm1, %v278_v35  ;;  %693 = vmatmul.msk.f32.gmra.mxu1 %vm332_vm1, %v278_v35  ;;  %v462_v35 = vld [vmem:[%s1137_s3] sm:$0xff] }
  0x40   : > { %477 = vperm.xlu0 %794, %v467_v36   ;;  %v463_v36 = vld [vmem:[%s1137_s3 + $0x8] sm:$0xff] }
  0x43   : > { %487 = vperm.xlu2 %796, %v469_v41  }
  0x47   : > { %685 = vmatmul.msk.f32.gmra.mxu0 %vm332_vm1, %v279_v38  ;;  %694 = vmatmul.msk.f32.gmra.mxu1 %vm332_vm1, %v279_v38  ;;  %v465_v38 = vld [vmem:[%s1137_s3 + $0x18] sm:$0xff] }
  0x4f   : > { %686 = vmatmul.msk.f32.gmra.mxu0 %vm332_vm1, %v280_v40  ;;  %695 = vmatmul.msk.f32.gmra.mxu1 %vm332_vm1, %v280_v40 }
  0x57   : > { %687 = vmatmul.msk.f32.gmra.mxu0 %vm332_vm1, %v281_v42  ;;  %696 = vmatmul.msk.f32.gmra.mxu1 %vm332_vm1, %v281_v42 }
  0x73   : > { %v310_v2 = vpop.permute.xlu2 %309 }
  0x88   : > { %v330_v45 = vpop.permute.xlu0 %329  ;;  %v320_v1 = vpop.permute.xlu1 %319 }
  0x8d   : > { %v305_v12 = vpop.permute.xlu2 %304 }
  0x95   : > { %v473_v39 = vpop.permute.xlu2 %472 }
  0x99   : > { %v315_v5 = vpop.permute.xlu1 %314 }
  0xa2   : > { %v325_v50 = vpop.permute.xlu0 %324 }
  0xa3   : > { %v295_v22 = vpop.permute.xlu1 %294 }
  0xaa   : > { %v300_v17 = vpop.permute.xlu0 %299 }
  0xac   : > { %v381_v43 = vpop.f32.mrf.mxu0  ;;  %v422_v44 = vpop.f32.mrf.mxu1 }
  0xad   : > { %v382_v27 = vadd.f32 %v381_v43, %v295_v22  ;;  %v423_v28 = vadd.f32 %v422_v44, %v295_v22 }
  0xaf   : > { %v446_v33 = vmax.f32 %v382_v27, 0.0  ;;  %v447_v34 = vmax.f32 %v423_v28, 0.0 }
  0xb4   : > { %v384_v46 = vpop.f32.mrf.mxu0  ;;  %v425_v47 = vpop.f32.mrf.mxu1 }
  0xb5   : > { %v399_v48 = vpop.f32.mrf.mxu2  ;;  %v385_v23 = vadd.f32 %v384_v46, %v300_v17  ;;  %v426_v24 = vadd.f32 %v425_v47, %v300_v17  ;;  %v478_v46 = vpop.permute.xlu0 %477 }
  0xb6   : > { %v440_v49 = vpop.f32.mrf.mxu3  ;;  %v400_v53 = vadd.f32 %v399_v48, %v325_v50 }
  0xb7   : > { %v441_v54 = vadd.f32 %v440_v49, %v325_v50  ;;  %v448_v31 = vmax.f32 %v385_v23, 0.0  ;;  %v449_v32 = vmax.f32 %v426_v24, 0.0 }
  0xb8   : > { %v458_v59 = vmax.f32 %v400_v53, 0.0  ;;  %v483_v53 = vpop.permute.xlu1 %482 }
  0xb9   : > { %v459_v61 = vmax.f32 %v441_v54, 0.0 }
  0xbc   : > { %v387_v51 = vpop.f32.mrf.mxu0  ;;  %v428_v52 = vpop.f32.mrf.mxu1 }
  0xbd   : > { %v402_v55 = vpop.f32.mrf.mxu2  ;;  %v388_v18 = vadd.f32 %v387_v51, %v305_v12  ;;  %v429_v19 = vadd.f32 %v428_v52, %v305_v12 }
  0xbe   : > { %v403_v56 = vadd.f32 %v402_v55, %v330_v45  ;;  %v443_v57 = vpop.f32.mrf.mxu3 }
  0xbf   : > { %v444_v58 = vadd.f32 %v443_v57, %v330_v45  ;;  %v450_v29 = vmax.f32 %v388_v18, 0.0  ;;  %v451_v30 = vmax.f32 %v429_v19, 0.0 }
  0xc0   : > { %v460_v60 = vmax.f32 %v403_v56, 0.0 }
  0xc1   : > { %v461_v62 = vmax.f32 %v444_v58, 0.0 }
  0xc2   : > { %511 = vmatpush.msrb.mxu2 %v460_v60  ;;  %v488_v60 = vpop.permute.xlu2 %487 }
  0xc3   : > { %540 = vmatpush.msrb.mxu3 %v461_v62 }
  0xc4   : > { %v390_v63 = vpop.f32.mrf.mxu0  ;;  %v431_v0 = vpop.f32.mrf.mxu1  ;;  %512 = vmatpush.msrb.mxu2 %v458_v59 }
  0xc5   : > { %541 = vmatpush.msrb.mxu3 %v459_v61  ;;  %v391_v13 = vadd.f32 %v390_v63, %v310_v2  ;;  %v432_v14 = vadd.f32 %v431_v0, %v310_v2 }
  0xc7   : > { %v452_v25 = vmax.f32 %v391_v13, 0.0  ;;  %v453_v26 = vmax.f32 %v432_v14, 0.0 }
  0xcc   : > { %v393_v3 = vpop.f32.mrf.mxu0  ;;  %v434_v4 = vpop.f32.mrf.mxu1 }
  0xcd   : > { %v394_v8 = vadd.f32 %v393_v3, %v315_v5  ;;  %v435_v9 = vadd.f32 %v434_v4, %v315_v5 }
  0xcf   : > { %v454_v20 = vmax.f32 %v394_v8, 0.0  ;;  %v455_v21 = vmax.f32 %v435_v9, 0.0 }
  0xd4   : > { %v396_v6 = vpop.f32.mrf.mxu0  ;;  %v437_v7 = vpop.f32.mrf.mxu1 }
  0xd5   : > { %v397_v10 = vadd.f32 %v396_v6, %v320_v1  ;;  %v438_v11 = vadd.f32 %v437_v7, %v320_v1 }
  0xd7   : > { %v456_v15 = vmax.f32 %v397_v10, 0.0  ;;  %v457_v16 = vmax.f32 %v438_v11, 0.0 }
  0xd9   : > { %513 = vmatpush.msrb.mxu2 %v456_v15  ;;  %542 = vmatpush.msrb.mxu3 %v457_v16 }
  0xdb   : > { %514 = vmatpush.msrb.mxu2 %v454_v20  ;;  %543 = vmatpush.msrb.mxu3 %v455_v21 }
  0xdd   : > { %515 = vmatpush.msrb.mxu2 %v452_v25  ;;  %544 = vmatpush.msrb.mxu3 %v453_v26 }
  0xdf   : > { %516 = vmatpush.msrb.mxu2 %v450_v29  ;;  %545 = vmatpush.msrb.mxu3 %v451_v30 }
  0xe1   : > { %517 = vmatpush.msrb.mxu2 %v448_v31  ;;  %546 = vmatpush.msrb.mxu3 %v449_v32 }
  0xe3   : > { %518 = vmatpush.msrb.mxu2 %v446_v33  ;;  %547 = vmatpush.msrb.mxu3 %v447_v34 }
  0xe4   : > { %699 = vmatmul.msk.f32.vlgmr.msrb.gmra.mxu2 %vm490_vm2, %v462_v35  ;;  %703 = vmatmul.msk.f32.vlgmr.msrb.gmra.mxu3 %vm490_vm2, %v462_v35 }
  0xec   : > { %700 = vmatmul.msk.f32.gmra.mxu2 %vm490_vm2, %v463_v36  ;;  %704 = vmatmul.msk.f32.gmra.mxu3 %vm490_vm2, %v463_v36 }
  0xf4   : > { %701 = vmatmul.msk.f32.gmra.mxu2 %vm490_vm2, %v464_v37  ;;  %705 = vmatmul.msk.f32.gmra.mxu3 %vm490_vm2, %v464_v37 }
  0xfc   : > { %702 = vmatmul.msk.f32.gmra.mxu2 %vm490_vm2, %v465_v38  ;;  %706 = vmatmul.msk.f32.gmra.mxu3 %vm490_vm2, %v465_v38 }
 0x167   : > { %v520_v40 = vpop.f32.mrf.mxu2  ;;  %v549_v41 = vpop.f32.mrf.mxu3 }
 0x168   : > { %v521_v42 = vadd.f32 %v520_v40, %v473_v39  ;;  %v550_v43 = vadd.f32 %v549_v41, %v473_v39 }
 0x16a   : > { %v561_v44 = vmax.f32 %v521_v42, 0.0  ;;  %v562_v45 = vmax.f32 %v550_v43, 0.0 }
 0x16c   : > { %569 = vst [vmem:[%s1085_s17] sm:$0xff] %v561_v44 }
 0x16d   : > { %570 = vst [vmem:[%s1085_s17 + $0x8] sm:$0xff] %v562_v45 }
 0x16f   : > { %v523_v47 = vpop.f32.mrf.mxu2  ;;  %v552_v48 = vpop.f32.mrf.mxu3 }
 0x170   : > { %v524_v49 = vadd.f32 %v523_v47, %v478_v46  ;;  %v553_v50 = vadd.f32 %v552_v48, %v478_v46 }
 0x172   : > { %v563_v51 = vmax.f32 %v524_v49, 0.0  ;;  %v564_v52 = vmax.f32 %v553_v50, 0.0 }
 0x174   : > { %571 = vst [vmem:[%s1085_s17 + $0x10] sm:$0xff] %v563_v51 }
 0x175   : > { %572 = vst [vmem:[%s1085_s17 + $0x18] sm:$0xff] %v564_v52 }
 0x177   : > { %v526_v54 = vpop.f32.mrf.mxu2  ;;  %v555_v55 = vpop.f32.mrf.mxu3 }
 0x178   : > { %v527_v56 = vadd.f32 %v526_v54, %v483_v53  ;;  %v556_v57 = vadd.f32 %v555_v55, %v483_v53 }
 0x17a   : > { %v565_v58 = vmax.f32 %v527_v56, 0.0  ;;  %v566_v59 = vmax.f32 %v556_v57, 0.0 }
 0x17c   : > { %573 = vst [vmem:[%s1085_s17 + $0x20] sm:$0xff] %v565_v58 }
 0x17d   : > { %574 = vst [vmem:[%s1085_s17 + $0x28] sm:$0xff] %v566_v59 }
 0x17f   : > { %v529_v61 = vpop.f32.mrf.mxu2  ;;  %v558_v62 = vpop.f32.mrf.mxu3 }
 0x180   : > { %v530_v63 = vadd.f32 %v529_v61, %v488_v60  ;;  %v559_v0 = vadd.f32 %v558_v62, %v488_v60 }
 0x182   : > { %v567_v1 = vmax.f32 %v530_v63, 0.0  ;;  %v568_v2 = vmax.f32 %v559_v0, 0.0 }
 0x184   : > { %575 = vst [vmem:[%s1085_s17 + $0x30] sm:$0xff] %v567_v1 }
 0x185   : > { %576 = vst [vmem:[%s1085_s17 + $0x38] sm:$0xff] %v568_v2 }
 0x186   : > { %824 = shalt.err (!%p821_p5)
}
 0x187   : > { %s878_s15 = smov 256   ;;  %s879_s17 = smov 16  }
 0x188   : > { %736 = dma.vmem_to_hbm [thread:$0]  (%p950_p4), %s593_s7, 1024, %s595_s8, %s578_s21, %s878_s15, %s878_s15, %s879_s17  }
 0x189 PF: > { %p742_p6 = scmp.ge.s32.totalorder %s875_s23, 2  ;;  %s609_s24 = sand.u32 1, %s855_s18  }
 0x18a   : > { %s610_s25 = scalar_lea.sflag [#allocation3], %s609_s24 }
 0x18b   : > { %p739_p7 = pnand %p742_p6, %p957_p8 }
 0x18d   : > { %p740_p9 = pneg %p739_p7 }
 0x18f   : > { %850 = dma.done.wait (%p740_p9), %s610_s25, 1024  }
 0x190   : > { %852 = vsyncadd (%p740_p9), %s610_s25, 4294966272  ;;  %s18_s23 = sadd.s32 1, %s875_s23   ;;  %s1142_s18 = smov %s859_s19 }
 0x191   : > { %p15_p10 = scmp.ge.s32.totalorder %s18_s23, 4   ;;  %s1143_s19 = smov %s863_s20 }
 0x192   : > { %s1144_s20 = smov %s963_s6  ;;  %s1145_s21 = smov %s871_s22 }
 0x193   : > { %s1146_s22 = smov %s1148_s26  ;;  %17 = sbr.rel (!%p15_p10) target bundleno = 4 (0x4), region = 75 }
 0x198   :  { %616 = vsyncpa [#allocation3], 1 }
 0x199   :  { %618 = vsyncpa [#allocation3 + $0x1], 1 }

</bundles_post_ra>
